<compile_context>
chip_gen: v6e
topology: v6e:2x2x1
jax: 0.10.0
libtpu: 0.0.40
codegen_flags: <defaults>
</compile_context>

<pallas_src>
import numpy as np
import jax
import jax.numpy as jnp
from jax.experimental import pallas as pl
from jax.experimental.pallas import tpu as pltpu


def _round_up(x, m):
    return ((x + m - 1) // m) * m


_MAX_BLOCK_LANES = 8192   # big blocks: compute is tiny, VMEM footprint ~1 MiB at 8192 lanes


def _rel_post_kernel(rel_ref, pair_ref, out_ref):
    """Per (image, relation-block) step.

    rel_ref:  (C, Rb)  relation class probs (native dtype), classes on sublanes
    pair_ref: (2, Rb)  f32 pre-gathered subject / object instance scores
    out_ref:  (3, Rb)  f32 slab: row0 = phrase prob, row1 = phrase label, row2 = overall
    """
    rel = rel_ref[...]                                          # (C, Rb), native dtype
    C, R = rel.shape

    # rel_prob[:, 0] = 0.0  (kill background class) — stays in native dtype
    cls_iota = jax.lax.broadcasted_iota(jnp.int32, (C, R), 0)
    masked = jnp.where(cls_iota == 0, jnp.zeros((), rel.dtype), rel)

    # phrase_pred_prob, phrase_pred_label = max(rel_prob, dim=classes)
    maxv_n = jnp.max(masked, axis=0, keepdims=True)             # (1, Rb) native dtype
    # first-occurrence argmax (matches torch CPU tie behaviour); compare in native dtype
    label = jnp.min(jnp.where(masked == maxv_n, cls_iota, C),
                    axis=0, keepdims=True)                      # (1, Rb) int32

    maxv = maxv_n.astype(jnp.float32)                           # cast only the reduced row
    overall = maxv * pair_ref[0:1, :] * pair_ref[1:2, :]        # (1, Rb) f32

    # three separate lane-dense row stores (no sublane concat relayout)
    out_ref[0:1, :] = maxv
    out_ref[1:2, :] = label.astype(jnp.float32)
    out_ref[2:3, :] = overall


def _run_batched_kernel(rel_t, pair_scores, r_block):
    """rel_t: (I, C, R_pad)  pair_scores: (I, 2, R_pad) f32  ->  (I, 3, R_pad) f32."""
    num_imgs, C, r_pad = rel_t.shape
    grid = (num_imgs, r_pad // r_block)
    return pl.pallas_call(
        _rel_post_kernel,
        grid_spec=pltpu.PrefetchScalarGridSpec(
            num_scalar_prefetch=0,
            grid=grid,
            in_specs=[
                pl.BlockSpec((None, C, r_block), lambda i, r: (i, 0, r)),
                pl.BlockSpec((None, 2, r_block), lambda i, r: (i, 0, r)),
            ],
            out_specs=pl.BlockSpec((None, 3, r_block), lambda i, r: (i, 0, r)),
        ),
        out_shape=jax.ShapeDtypeStruct((num_imgs, 3, r_pad), jnp.float32),
        compiler_params=pltpu.CompilerParams(
            dimension_semantics=("parallel", "parallel"),
            vmem_limit_bytes=32 * 1024 * 1024,
        ),
    )(rel_t, pair_scores)


def det_relation_result_postprocess(rel_det_prob, inst_scores_list,
                                    connect_arrs, topk):
    """JAX equivalent of the RelationResultPostProcess hot path.

    rel_det_prob:     [sum_R, C] relation class probabilities (all images)
    inst_scores_list: list of per-image instance score arrays [N_i]
    connect_arrs:     list of per-image int arrays [2, R_i] (sub_idx, obj_idx)
    Returns per image: (conn_arr_topk.T [k, 2], phrase_label [k], phrase_prob [k])
    """
    num_imgs = len(inst_scores_list)
    rel_lens = [int(c.shape[1]) for c in connect_arrs]
    inst_lens = [int(s.shape[0]) for s in inst_scores_list]
    sum_rel = int(rel_det_prob.shape[0])

    # ---- block / pad sizing: pad relations to 128 lanes; r_block is an exact
    # divisor of r_pad and at most _MAX_BLOCK_LANES (no rounding-to-block blow-up)
    max_rel = max(rel_lens)
    r_pad = _round_up(max_rel, 128)
    num_blocks = -(-r_pad // _MAX_BLOCK_LANES)
    r_block = _round_up(-(-r_pad // num_blocks), 128)
    r_pad = r_block * num_blocks

    # ---- vectorized host-side prep (bulk ops, no per-image transpose/pad loop) ----
    # subject/object scores per relation, gathered over ALL images at once
    inst_offsets = np.cumsum([0] + inst_lens[:-1])
    global_conn = jnp.concatenate(
        [connect_arrs[i].astype(jnp.int32) + int(inst_offsets[i])
         for i in range(num_imgs)], axis=1)                              # (2, sum_R)
    all_scores = jnp.concatenate(
        [s.astype(jnp.float32) for s in inst_scores_list])               # (sum_N,)
    pair_flat = jnp.take(all_scores, global_conn, axis=0)                # (2, sum_R) f32

    rel_t_flat = rel_det_prob.T                                          # (C, sum_R), native dtype

    rel_offsets = np.cumsum([0] + rel_lens[:-1])
    lane = np.arange(r_pad)
    idx_grid_np = rel_offsets[:, None] + lane[None, :]                   # (I, r_pad)
    valid = lane[None, :] < np.asarray(rel_lens)[:, None]
    idx_grid = jnp.asarray(np.where(valid, idx_grid_np, sum_rel), jnp.int32)  # OOB -> fill 0

    rel_t = jnp.transpose(
        jnp.take(rel_t_flat, idx_grid, axis=1, mode='fill', fill_value=0),
        (1, 0, 2))                                                       # (I, C, r_pad)
    pair_scores = jnp.transpose(
        jnp.take(pair_flat, idx_grid, axis=1, mode='fill', fill_value=0.0),
        (1, 0, 2))                                                       # (I, 2, r_pad)

    out = _run_batched_kernel(rel_t, pair_scores, r_block)               # (I, 3, r_pad) f32

    # TODO(synk): per-image top-k / ragged gathers (and the original module's
    # detection-pair <-> proposal-pair matching loop) stay in plain JAX glue.
    results = []
    for i, conn in enumerate(connect_arrs):
        r = rel_lens[i]
        prob = out[i, 0, :r]
        label = out[i, 1, :r].astype(jnp.int32)   # exact: labels < 2^24
        overall = out[i, 2, :r]
        k = min(topk, r)
        _, topk_idx = jax.lax.top_k(overall, k)   # sorted descending
        conn_sel = conn[:, topk_idx]              # (2, k)
        results.append((conn_sel.T, label[topk_idx], prob[topk_idx]))
    return results


if __name__ == "__main__":
    key = jax.random.PRNGKey(0)
    C = 16          # number of relation classes (incl. background col 0)
    topk = 5        # cfg.MODEL.RELATION.TOPK_TRIPLETS[-1]

    # two images with different numbers of instances / relation pairs
    img_cfg = [(6, 12), (4, 8)]   # (num_instances, num_relations)
    inst_scores_list, connect_arrs, rel_chunks = [], [], []
    for n_inst, n_rel in img_cfg:
        key, k1, k2, k3, k4 = jax.random.split(key, 5)
        inst_scores_list.append(jax.random.uniform(k1, (n_inst,), jnp.float32))
        sub = jax.random.randint(k2, (n_rel,), 0, n_inst, jnp.int32)
        obj = jax.random.randint(k3, (n_rel,), 0, n_inst, jnp.int32)
        connect_arrs.append(jnp.stack([sub, obj], axis=0))
        rel_chunks.append(jax.random.uniform(k4, (n_rel, C), jnp.float32))
    rel_det_prob = jnp.concatenate(rel_chunks, axis=0)

    results = det_relation_result_postprocess(
        rel_det_prob, inst_scores_list, connect_arrs, topk)

    for conn_t, labels, probs in results:
        jax.block_until_ready(conn_t)
        jax.block_until_ready(labels)
        jax.block_until_ready(probs)

    # sanity check against a pure-JAX reference for every image
    start = 0
    for i, (n_inst, n_rel) in enumerate(img_cfg):
        rel_i = rel_det_prob[start:start + n_rel].at[:, 0].set(0.0)
        start += n_rel
        ref_prob = jnp.max(rel_i, axis=1)
        ref_label = jnp.argmax(rel_i, axis=1)
        ref_overall = (ref_prob
                       * inst_scores_list[i][connect_arrs[i][0]]
                       * inst_scores_list[i][connect_arrs[i][1]])
        k = min(topk, n_rel)
        _, ref_idx = jax.lax.top_k(ref_overall, k)
        conn_t, labels, probs = results[i]
        assert jnp.allclose(probs, ref_prob[ref_idx], atol=1e-6)
        assert jnp.array_equal(labels, ref_label[ref_idx].astype(jnp.int32))
        assert jnp.array_equal(conn_t, connect_arrs[i][:, ref_idx].T)

    print("KERNEL_OK")
</pallas_src>

<mosaic_0001>
module attributes {stable_mosaic.version = 11 : i64} {
  func.func @_rel_post_kernel(%arg0: i32, %arg1: i32, %arg2: memref<1x16x128xf32, #tpu.memory_space<vmem>>, %arg3: memref<1x2x128xf32, #tpu.memory_space<vmem>>, %arg4: memref<1x3x128xf32, #tpu.memory_space<vmem>>) attributes {dimension_semantics = [#tpu.dimension_semantics<parallel>, #tpu.dimension_semantics<parallel>], iteration_bounds = array<i64: 2, 1>, scalar_prefetch = 0 : i64, scratch_operands = 0 : i64, tpu.core_type = #tpu.core_type<tc>, window_params = [{transform_indices = @transform_0, window_bounds = array<i64: 1, 16, 128>}, {transform_indices = @transform_1, window_bounds = array<i64: 1, 2, 128>}, {transform_indices = @transform_2, window_bounds = array<i64: 1, 3, 128>}]} {
    %c0 = arith.constant 0 : index
    %c0_0 = arith.constant 0 : index
    %c0_1 = arith.constant 0 : index
    %0 = vector.load %arg2[%c0, %c0_0, %c0_1] : memref<1x16x128xf32, #tpu.memory_space<vmem>>, vector<1x16x128xf32>
    %1 = vector.shape_cast %0 : vector<1x16x128xf32> to vector<16x128xf32>
    %2 = tpu.iota {dimensions = array<i32: 0>} : vector<16x128xi32>
    %c0_i32 = arith.constant 0 : i32
    %3 = vector.broadcast %c0_i32 : i32 to vector<16x128xi32>
    %4 = arith.cmpi eq, %2, %3 : vector<16x128xi32>
    %cst = arith.constant 0.000000e+00 : f32
    %5 = vector.broadcast %cst : f32 to vector<16x128xf32>
    %6 = arith.select %4, %5, %1 : vector<16x128xi1>, vector<16x128xf32>
    %cst_2 = arith.constant dense<0xFF800000> : vector<128xf32>
    %7 = vector.multi_reduction <maximumf>, %6, %cst_2 [0] : vector<16x128xf32> to vector<128xf32>
    %8 = vector.shape_cast %7 : vector<128xf32> to vector<1x128xf32>
    %9 = vector.broadcast %8 : vector<1x128xf32> to vector<16x128xf32>
    %10 = arith.cmpf oeq, %6, %9 : vector<16x128xf32>
    %c16_i32 = arith.constant 16 : i32
    %11 = vector.broadcast %c16_i32 : i32 to vector<16x128xi32>
    %12 = arith.select %10, %2, %11 : vector<16x128xi1>, vector<16x128xi32>
    %cst_3 = arith.constant dense<2147483647> : vector<128xi32>
    %13 = vector.multi_reduction <minsi>, %12, %cst_3 [0] : vector<16x128xi32> to vector<128xi32>
    %14 = vector.shape_cast %13 : vector<128xi32> to vector<1x128xi32>
    %c0_4 = arith.constant 0 : index
    %c0_5 = arith.constant 0 : index
    %c0_6 = arith.constant 0 : index
    %15 = vector.load %arg3[%c0_4, %c0_5, %c0_6] : memref<1x2x128xf32, #tpu.memory_space<vmem>>, vector<1x1x128xf32>
    %16 = vector.shape_cast %15 : vector<1x1x128xf32> to vector<1x128xf32>
    %17 = arith.mulf %8, %16 : vector<1x128xf32>
    %c0_7 = arith.constant 0 : index
    %c1 = arith.constant 1 : index
    %c0_8 = arith.constant 0 : index
    %18 = vector.load %arg3[%c0_7, %c1, %c0_8] : memref<1x2x128xf32, #tpu.memory_space<vmem>>, vector<1x1x128xf32>
    %19 = vector.shape_cast %18 : vector<1x1x128xf32> to vector<1x128xf32>
    %20 = arith.mulf %17, %19 : vector<1x128xf32>
    %c0_9 = arith.constant 0 : index
    %c0_10 = arith.constant 0 : index
    %c0_11 = arith.constant 0 : index
    %21 = vector.load %arg4[%c0_9, %c0_10, %c0_11] : memref<1x3x128xf32, #tpu.memory_space<vmem>>, vector<1x1x128xf32>
    %22 = vector.shape_cast %21 : vector<1x1x128xf32> to vector<1x128xf32>
    %23 = vector.shape_cast %8 : vector<1x128xf32> to vector<1x1x128xf32>
    tpu.vector_store %arg4[%c0_9, %c0_10, %c0_11], %23 {strides = array<i32>} : memref<1x3x128xf32, #tpu.memory_space<vmem>>, vector<1x1x128xf32>,
    %24 = arith.sitofp %14 : vector<1x128xi32> to vector<1x128xf32>
    %c0_12 = arith.constant 0 : index
    %c1_13 = arith.constant 1 : index
    %c0_14 = arith.constant 0 : index
    %25 = vector.load %arg4[%c0_12, %c1_13, %c0_14] : memref<1x3x128xf32, #tpu.memory_space<vmem>>, vector<1x1x128xf32>
    %26 = vector.shape_cast %25 : vector<1x1x128xf32> to vector<1x128xf32>
    %27 = vector.shape_cast %24 : vector<1x128xf32> to vector<1x1x128xf32>
    tpu.vector_store %arg4[%c0_12, %c1_13, %c0_14], %27 {strides = array<i32>} : memref<1x3x128xf32, #tpu.memory_space<vmem>>, vector<1x1x128xf32>,
    %c0_15 = arith.constant 0 : index
    %c2 = arith.constant 2 : index
    %c0_16 = arith.constant 0 : index
    %28 = vector.load %arg4[%c0_15, %c2, %c0_16] : memref<1x3x128xf32, #tpu.memory_space<vmem>>, vector<1x1x128xf32>
    %29 = vector.shape_cast %28 : vector<1x1x128xf32> to vector<1x128xf32>
    %30 = vector.shape_cast %20 : vector<1x128xf32> to vector<1x1x128xf32>
    tpu.vector_store %arg4[%c0_15, %c2, %c0_16], %30 {strides = array<i32>} : memref<1x3x128xf32, #tpu.memory_space<vmem>>, vector<1x1x128xf32>,
    return
  }
  func.func @transform_0(%arg0: i32, %arg1: i32) -> (i32, i32, i32) {
    %c0_i32 = arith.constant 0 : i32
    %c0_i32_0 = arith.constant 0 : i32
    return %arg0, %c0_i32, %arg1 : i32, i32, i32
  }
  func.func @transform_1(%arg0: i32, %arg1: i32) -> (i32, i32, i32) {
    %c0_i32 = arith.constant 0 : i32
    %c0_i32_0 = arith.constant 0 : i32
    return %arg0, %c0_i32, %arg1 : i32, i32, i32
  }
  func.func @transform_2(%arg0: i32, %arg1: i32) -> (i32, i32, i32) {
    %c0_i32 = arith.constant 0 : i32
    %c0_i32_0 = arith.constant 0 : i32
    return %arg0, %c0_i32, %arg1 : i32, i32, i32
  }
}

</mosaic_0001>

<bundles_post_ra>
// kernel: tpu_custom_call.1
= control target key start
LH: loop header
LB: loop body
LE: loop exit
PB: predicated region body
PF: predicated region fallthrough
CT: control target
= control target key end

     0   :  { %7 = vsyncpa [#allocation3], 0  ;;  %s707_s0 = inlined_call_operand.hbm [shape: f32[2,16,128], index: 0, kind: input, shape index: {}]   ;;  %s708_s1 = inlined_call_operand.hbm [shape: f32[2,2,128], index: 1, kind: input, shape index: {}]   ;;  %s709_s2 = inlined_call_operand.vmem [shape: f32[2,3,128], index: 2, kind: output, shape index: {}]  }
   0x1   :  { %9 = vsyncpa [#allocation3 + $0x1], 0 }
   0x2   :  { %10 = vsyncpa [#allocation5], 0 }
   0x3   :  { %12 = vsyncpa [#allocation5 + $0x1], 0  ;;  %s583_s9 = smov 0   ;;  %s585_s10 = smov 0  }
   0x4   :  { %s587_s11 = smov 0   ;;  %s589_s12 = smov 0  }
   0x5   :  { %s591_s13 = smov 0   ;;  %s593_s14 = smov 0  }
   0x6 LB: > { %s373_s15 = sadd.s32 4294967295, %s562_s14   ;;  %s30_s16 = sadd.s32 1, %s558_s13  ;;  %s562_s14 = sphi %s593_s14, %s18_s14   ;;  %s558_s13 = sphi %s591_s13, %s718_s13   ;;  %s554_s12 = sphi %s589_s12, %s717_s12   ;;  %s550_s11 = sphi %s587_s11, %s716_s11   ;;  %s546_s10 = sphi %s585_s10, %s715_s10   ;;  %s542_s9 = sphi %s583_s9, %s714_s9  }
   0x7   : > { %p32_p0 = scmp.ge.s32.totalorder %s30_s16, 2  ;;  %s39_s17 = sadd.s32 1, %s550_s11 }
   0x8   : > { %p46_p1 = scmp.ne.s32.totalorder %s550_s11, %s546_s10  ;;  %p47_p2 = scmp.eq.s32.totalorder %s562_s14, 0 }
   0x9   : > { %s720_s16 = smov (%p32_p0, %s30_s16), 0  ;;  %p52_p4 = scmp.ne.s32.totalorder %s546_s10, %s542_s9 }
   0xa   : > { %p619_p3 = por %p47_p2, %p46_p1  ;;  %s34_s19 = ssub.s32 %s558_s13, %s720_s16 }
   0xb   : > { %p53_p5 = scmp.eq.s32.totalorder %s373_s15, 0  ;;  %p37_p6 = scmp.eq.s32.totalorder %s34_s19, 0 }
   0xc   : > { %p401_p8 = scmp.lt.s32.totalorder %s562_s14, 2  ;;  %s635_s22 = sand.u32 1, %s550_s11  }
   0xd   : > { %p626_p7 = por %p53_p5, %p52_p4  ;;  %s389_s23 = sshll.u32 %s558_s13, 8 }
   0xe   : > { %s632_s21 = scalar_select %p37_p6, %s550_s11, %s39_s17  }
   0xf   : > { %s377_s24 = sshll.u32 %s635_s22, 4  ;;  %s143_s27 = scalar_lea.hbm %s707_s0, %s389_s23 }
  0x10   : > { %s136_s28 = scalar_lea.vmem [#allocation2], %s377_s24  ;;  %p644_p9 = pnand %p401_p8, %p619_p3 }
  0x11   : > { %s144_s29 = sshll.u32 %s136_s28, 4  ;;  %s133_s3 = scalar_lea.sflag [#allocation3], %s635_s22  ;;  %s145_s29 = int_to_ptr.vmem [resolvable:$true] %s144_s29 }
  0x12   : > { %p454_p10 = pneg %p644_p9  ;;  %s465_s4 = scalar_lea.vmem %s145_s29, 256 }
  0x13   : > { %p466_p11 = scmp.ne.s32.totalorder %s145_s29, %s465_s4  ;;  %s564_s5 = smov [#allocation2]  }
  0x14   : > { %s470_s6 = sshll.u32 %s564_s5, 4  ;;  %s471_s6 = int_to_ptr.vmem [resolvable:$false] %s470_s6 }
  0x15   : > { %p468_p12 = pnand %p466_p11, %p454_p10  ;;  %s472_s7 = scalar_lea.vmem %s471_s6, 512 }
  0x16   : > { %p473_p0 = scmp.lt.s32.totalorder %s145_s29, %s471_s6  ;;  %p474_p1 = scmp.lt.s32.totalorder %s472_s7, %s465_s4 }
  0x17   : > { %p469_p13 = pneg %p468_p12 }
  0x18   : > { %p475_p2 = por %p474_p1, %p473_p0 }
  0x1a   : > { %p476_p3 = pnand %p475_p2, %p469_p13 }
  0x1c   : > { %479 = shalt.err (!%p476_p3)
}
  0x1d   : > { %s565_s8 = smov 128   ;;  %s566_s9 = smov 8  }
  0x1e   : > { %397 = dma.hbm_to_vmem [thread:$0]  (!%p644_p9), %s143_s27, 256, %s145_s29, %s133_s3, %s565_s8, %s565_s8, %s566_s9  }
  0x1f   : > { %p382_p4 = scmp.ge.s32.totalorder %s562_s14, 1  ;;  %p171_p5 = scmp.lt.s32.totalorder %s562_s14, 3 }
  0x20   : > { %s380_s15 = sshll.u32 %s635_s22, 1  ;;  %s381_s18 = sshll.u32 %s558_s13, 5 }
  0x21   : > { %p659_p6 = pnand %p382_p4, %p171_p5  ;;  %s158_s19 = scalar_lea.vmem [#allocation4], %s380_s15 }
  0x22   : > { %s166_s23 = sshll.u32 %s158_s19, 4  ;;  %s164_s26 = scalar_lea.hbm %s708_s1, %s381_s18  ;;  %s167_s23 = int_to_ptr.vmem [resolvable:$true] %s166_s23 }
  0x23   : > { %s155_s28 = scalar_lea.sflag [#allocation5], %s635_s22  ;;  %s493_s4 = scalar_lea.vmem %s167_s23, 32 }
  0x24   : > { %p494_p8 = scmp.ne.s32.totalorder %s167_s23, %s493_s4  ;;  %s567_s27 = smov [#allocation4]  }
  0x25   : > { %s498_s29 = sshll.u32 %s567_s27, 4  ;;  %s499_s29 = int_to_ptr.vmem [resolvable:$false] %s498_s29 }
  0x26   : > { %p496_p11 = pnand %p494_p8, %p454_p10  ;;  %s500_s3 = scalar_lea.vmem %s499_s29, 64 }
  0x27   : > { %p501_p13 = scmp.lt.s32.totalorder %s167_s23, %s499_s29  ;;  %p502_p0 = scmp.lt.s32.totalorder %s500_s3, %s493_s4 }
  0x28   : > { %p497_p12 = pneg %p496_p11 }
  0x29   : > { %p503_p1 = por %p502_p0, %p501_p13 }
  0x2b   : > { %p504_p2 = pnand %p503_p1, %p497_p12 }
  0x2d   : > { %507 = shalt.err (!%p504_p2)
}
  0x2e   : > { %400 = dma.hbm_to_vmem [thread:$0]  (!%p644_p9), %s164_s26, 32, %s167_s23, %s155_s28  }
  0x2f   : > { %175 = sbr.rel (%p659_p6) target bundleno = 90 (0x5a), region = 28  ;;  %s177_s22 = sand.u32 (!%p659_p6), 1, %s546_s10  }
  0x30   : > { %s383_s5 = sshll.u32 (!%p659_p6), %s177_s22, 4  ;;  %s178_s6 = scalar_lea.sflag (!%p659_p6), [#allocation3], %s177_s22 }
  0x31   : > { %s181_s7 = scalar_lea.vmem (!%p659_p6), [#allocation2], %s383_s5 }
  0x34   : > { %533 = dma.done.wait (%p626_p7), %s178_s6, 256  }
  0x35   : > { %535 = vsyncadd (%p626_p7), %s178_s6, 4294967040  ;;  %s384_s8 = sshll.u32 %s177_s22, 1  ;;  %s187_s9 = scalar_lea.sflag [#allocation5], %s177_s22 }
  0x36   : > { %s190_s15 = scalar_lea.vmem [#allocation4], %s384_s8 }
  0x37   : > { %537 = dma.done.wait (%p626_p7), %s187_s9, 32  }
  0x38   : > { %539 = vsyncadd (%p626_p7), %s187_s9, 4294967264  ;;  %v386_v0 = vld [vmem:[%s181_s7] sm:$0xfe]  ;;  %v226_v1 = vld [vmem:[%s181_s7 + $0x8] sm:$0xff]  ;;  %p218_p9 = scmp.lt.s32.totalorder %s554_s12, 1  ;;  %v227_v4 = vlaneseq }
  0x39   : > { %v234_v2 = vmax.f32 %v386_v0, %v226_v1  ;;  %v256_v11 = vld [vmem:[%s190_s15] sm:$0x1]  ;;  %v258_v13 = vld [vmem:[%s190_s15 + $0x1] sm:$0x1] }
  0x3a   : > { %s722_s12 = smov (!%p218_p9, %s554_s12), 1  ;;  %v228_v7 = vshrl.u32 %v227_v4, 7 }
  0x3b   : > { %v235_v3 = vrot.slane %v234_v2, 4  ;;  %s385_s30 = sshll.u32 %s722_s12, 2 }
  0x3c   : > { %s224_s20 = scalar_lea.vmem %s709_s2, %s385_s30  ;;  %v229_v10 = vadd.s32 8, %v228_v7 }
  0x3d   : > { %v236_v5 = vmax.f32 %v234_v2, %v235_v3 }
  0x3f   : > { %v237_v6 = vrot.slane %v236_v5, 2 }
  0x41   : > { %v238_v8 = vmax.f32 %v236_v5, %v237_v6 }
  0x43   : > { %v239_v9 = vrot.slane %v238_v8, 1 }
  0x45   : > { %v240_v12 = vmax.f32 %v238_v8, %v239_v9 }
  0x47   : > { %260 = vst [vmem:[%s224_s20] sm:$0x1] %v240_v12  ;;  %vm241_vm0 = vcmp.eq.f32.partialorder %v386_v0, %v240_v12  ;;  %vm242_vm1 = vcmp.eq.f32.partialorder %v226_v1, %v240_v12  ;;  %v257_v14 = vmul.f32 %v256_v11, %v240_v12 }
  0x48   : > { %v243_v15 = vsel %vm241_vm0, %v228_v7, 16  ;;  %v244_v16 = vsel %vm242_vm1, %v229_v10, 16 }
  0x49   : > { %vm245_vm2 = vcmp.lt.s32.totalorder %v243_v15, %v244_v16  ;;  %v259_v17 = vmul.f32 %v258_v13, %v257_v14 }
  0x4a   : > { %v246_v18 = vsel %vm245_vm2, %v243_v15, %v244_v16 }
  0x4b   : > { %v247_v19 = vrot.slane %v246_v18, 4  ;;  %263 = vst [vmem:[%s224_s20 + $0x2] sm:$0x1] %v259_v17 }
  0x4d   : > { %vm248_vm3 = vcmp.lt.s32.totalorder %v246_v18, %v247_v19 }
  0x4e   : > { %v249_v20 = vsel %vm248_vm3, %v246_v18, %v247_v19 }
  0x4f   : > { %v250_v21 = vrot.slane %v249_v20, 2 }
  0x51   : > { %vm251_vm4 = vcmp.lt.s32.totalorder %v249_v20, %v250_v21 }
  0x52   : > { %v252_v22 = vsel %vm251_vm4, %v249_v20, %v250_v21 }
  0x53   : > { %v253_v23 = vrot.slane %v252_v22, 1 }
  0x55   : > { %vm254_vm5 = vcmp.lt.s32.totalorder %v252_v22, %v253_v23 }
  0x56   : > { %v255_v24 = vsel %vm254_vm5, %v252_v22, %v253_v23 }
  0x57   : > { %v261_v25 = vcvt.s32.f32 %v255_v24 }
  0x59   : > { %262 = vst [vmem:[%s224_s20 + $0x1] sm:$0x1] %v261_v25 }
  0x5a PF: > { %s18_s14 = sadd.s32 1, %s562_s14   ;;  %s714_s9 = smov %s546_s10 }
  0x5b   : > { %p15_p7 = scmp.ge.s32.totalorder %s18_s14, 4   ;;  %s715_s10 = smov %s550_s11 }
  0x5c   : > { %s716_s11 = smov %s632_s21  ;;  %s717_s12 = smov %s558_s13 }
  0x5d   : > { %s718_s13 = smov %s720_s16  ;;  %17 = sbr.rel (!%p15_p7) target bundleno = 6 (0x6), region = 81 }
  0x62   :  { %289 = vsyncpa [#allocation3], 1 }
  0x63   :  { %291 = vsyncpa [#allocation3 + $0x1], 1 }
  0x64   :  { %292 = vsyncpa [#allocation5], 1 }
  0x65   :  { %294 = vsyncpa [#allocation5 + $0x1], 1 }

</bundles_post_ra>
